<compile_context>
chip_gen: v7x
topology: tpu7x:2x2x1
jax: 0.10.0
libtpu: 0.0.40
codegen_flags: <defaults>
</compile_context>

<pallas_src>
import functools

import jax
import jax.numpy as jnp
from jax.experimental import pallas as pl
from jax.experimental.pallas import tpu as pltpu


def _round_up(x, m):
    return ((x + m - 1) // m) * m


def _vmem_budget():
    """Generation-aware VMEM sizing -> (per-step working-set budget, scoped limit)."""
    cap = 64 << 20  # assume the smallest (v7x per-TC physical) if the query fails
    try:
        cap = int(getattr(pltpu.get_tpu_info(), "vmem_capacity_bytes", cap))
    except Exception:
        pass
    limit = min(cap // 2, 64 << 20)     # scoped limit we request from the compiler
    budget = min(limit // 2, 32 << 20)  # per-step footprint target (dbuf + f32 temps)
    return budget, limit


def _focal_factor(pt, gamma):
    if gamma == 0.0:
        return jnp.ones_like(pt)
    if gamma == 1.0:
        return 1.0 - pt
    if gamma == 2.0:
        q = 1.0 - pt
        return q * q
    return (1.0 - pt) ** gamma


# ----------------------------------------------------------------------------
# NCHW-direct kernel: classes on sublanes, pixels on lanes (no wrapper transpose)
# ----------------------------------------------------------------------------
def _focal_ce_nchw_kernel(logits_ref, tgt_ref, *rest, gamma: float,
                          ignore_index: int, n_pix: int, tile_p: int,
                          has_weight: bool):
    if has_weight:
        w_ref, out_ref = rest
    else:
        (out_ref,) = rest
    p = pl.program_id(1)

    x = logits_ref[...].astype(jnp.float32)            # (C, TP)
    t = tgt_ref[...]                                    # (1, TP) int32

    # Mask pixels past the logical end (partial last pixel tile holds garbage).
    lane = jax.lax.broadcasted_iota(jnp.int32, t.shape, 1)       # (1, TP)
    in_range = (p * tile_p + lane) < n_pix                        # (1, TP)

    cls = jax.lax.broadcasted_iota(jnp.int32, x.shape, 0)         # (C, TP)
    onehot = cls == t                                             # (C, TP)

    # Numerically stable logsumexp over the class (sublane) axis.
    m = jnp.max(x, axis=0, keepdims=True)                         # (1, TP)
    lse = jnp.log(jnp.sum(jnp.exp(x - m), axis=0, keepdims=True)) + m

    # Gather target logit via one-hot masked sublane reduce.
    x_t = jnp.sum(jnp.where(onehot, x, 0.0), axis=0, keepdims=True)   # (1, TP)

    logpt = x_t - lse
    pt = jnp.exp(logpt)
    focal = _focal_factor(pt, gamma)

    valid = jnp.logical_and(in_range, t != ignore_index)
    loss = -focal * logpt
    if has_weight:
        w_t = jnp.sum(jnp.where(onehot, w_ref[...], 0.0), axis=0, keepdims=True)
        loss = loss * w_t
    # Keep this a true select: garbage lanes can be NaN/Inf and must not leak.
    loss = jnp.where(valid, loss, 0.0)

    part_sum = jnp.sum(loss)
    part_cnt = jnp.sum(valid.astype(jnp.float32))

    lane_o = jax.lax.broadcasted_iota(jnp.int32, out_ref.shape,
                                      len(out_ref.shape) - 1)
    out_ref[...] = jnp.where(lane_o == 0, part_sum,
                             jnp.where(lane_o == 1, part_cnt, 0.0))


def _choose_pixel_tile(hw, n_classes, itemsize, budget, n_batch):
    c_sub = _round_up(max(int(n_classes), 1), 8)   # sublane-padded class count
    # Padding-aware per-pixel VMEM cost: double-buffered logits block,
    # double-buffered int32 target block ((1,tp) pads to 8 sublanes),
    # plus ~3 f32 temporaries of the logits tile (cast, exp, select scratch).
    per_px = 2 * c_sub * itemsize + 2 * 8 * 4 + 3 * c_sub * 4
    tp = max(128, (int(budget) // per_px) // 128 * 128)
    if tp >= hw:
        tp = hw                      # single full-width block (block dim == array dim)
        if n_batch == 1 and hw > 256:
            # Keep >= 2 grid steps so both v7x TensorCores get work.
            half = _round_up(-(-hw // 2), 128)
            if half < hw:
                tp = half
    return tp


def _focal_ce_nchw(preds, target, gamma, size_average, ignore_index, weight,
                   budget, vmem_limit):
    B, C, H, W = preds.shape
    hw = H * W
    logits = preds.reshape(B, C, hw)                    # free (contiguous) reshape
    tgt = target.reshape(B, 1, hw).astype(jnp.int32)    # free reshape

    itemsize = jnp.dtype(preds.dtype).itemsize
    tile_p = _choose_pixel_tile(hw, C, itemsize, budget, B)
    num_p = int(pl.cdiv(hw, tile_p))

    has_weight = weight is not None
    kernel = functools.partial(
        _focal_ce_nchw_kernel, gamma=float(gamma), ignore_index=int(ignore_index),
        n_pix=int(hw), tile_p=int(tile_p), has_weight=has_weight)

    in_specs = [
        pl.BlockSpec((None, C, tile_p), lambda b, p: (b, 0, p)),   # logits pixel tile
        pl.BlockSpec((None, 1, tile_p), lambda b, p: (b, 0, p)),   # targets pixel tile
    ]
    args = [logits, tgt]
    if has_weight:
        in_specs.append(pl.BlockSpec((C, 1), lambda b, p: (0, 0)))  # class weights
        args.append(jnp.asarray(weight, jnp.float32).reshape(C, 1))

    partials = pl.pallas_call(
        kernel,
        out_shape=jax.ShapeDtypeStruct((B, num_p, 1, 128), jnp.float32),
        grid_spec=pltpu.PrefetchScalarGridSpec(
            num_scalar_prefetch=0,
            grid=(B, num_p),
            in_specs=in_specs,
            out_specs=pl.BlockSpec((1, 1, 1, 128), lambda b, p: (b, p, 0, 0)),
        ),
        compiler_params=pltpu.CompilerParams(
            dimension_semantics=("parallel", "parallel"),
            vmem_limit_bytes=int(vmem_limit)),
    )(*args)

    total = jnp.sum(partials[:, :, 0, 0])
    count = jnp.sum(partials[:, :, 0, 1])
    if size_average:
        return total / count
    return total


# ----------------------------------------------------------------------------
# Row-tiled kernel for already-flat (N, C) inputs: rows on sublanes, classes on lanes
# ----------------------------------------------------------------------------
def _focal_ce_rows_kernel(logits_ref, tgt_ref, *rest, gamma: float,
                          ignore_index: int, n_rows: int, tile_n: int,
                          has_weight: bool):
    if has_weight:
        w_ref, out_ref = rest
    else:
        (out_ref,) = rest
    i = pl.program_id(0)

    x = logits_ref[...].astype(jnp.float32)             # (TN, C)
    t = tgt_ref[...]                                     # (TN, 1) int32

    row = jax.lax.broadcasted_iota(jnp.int32, t.shape, 0)           # (TN, 1)
    in_range = (i * tile_n + row) < n_rows

    col = jax.lax.broadcasted_iota(jnp.int32, x.shape, 1)           # (TN, C)
    onehot = col == t

    m = jnp.max(x, axis=-1, keepdims=True)
    lse = jnp.log(jnp.sum(jnp.exp(x - m), axis=-1, keepdims=True)) + m
    x_t = jnp.sum(jnp.where(onehot, x, 0.0), axis=-1, keepdims=True)

    logpt = x_t - lse
    pt = jnp.exp(logpt)
    focal = _focal_factor(pt, gamma)

    valid = jnp.logical_and(in_range, t != ignore_index)
    loss = -focal * logpt
    if has_weight:
        w_t = jnp.sum(jnp.where(onehot, w_ref[...], 0.0), axis=-1, keepdims=True)
        loss = loss * w_t
    loss = jnp.where(valid, loss, 0.0)

    part_sum = jnp.sum(loss)
    part_cnt = jnp.sum(valid.astype(jnp.float32))

    lane_o = jax.lax.broadcasted_iota(jnp.int32, out_ref.shape,
                                      len(out_ref.shape) - 1)
    out_ref[...] = jnp.where(lane_o == 0, part_sum,
                             jnp.where(lane_o == 1, part_cnt, 0.0))


def _choose_row_tile(n_rows, n_classes, itemsize, budget):
    # TODO(synk): for C <= 64 a lane-dense packing (128//C rows per vreg row)
    # would cut the wasted lane work on this path; the NCHW inputs already get
    # full lane utilization via the NCHW-direct kernel.
    c_lane = _round_up(max(int(n_classes), 1), 128)   # lane-padded class count
    per_row = 2 * c_lane * itemsize + 2 * 128 * 4 + 3 * c_lane * 4
    tn = max(8, (int(budget) // per_row) // 8 * 8)
    tn = min(tn, max(8, (int(n_rows) // 8) * 8))
    if -(-n_rows // tn) == 1 and n_rows >= 2048:
        tn = max(8, ((n_rows // 2) // 8) * 8)          # keep >= 2 grid steps (v7x)
    return tn


def _focal_ce_rows(logits, target, gamma, size_average, ignore_index, weight,
                   budget, vmem_limit):
    N, C = logits.shape
    tgt = target.reshape(-1, 1).astype(jnp.int32)

    itemsize = jnp.dtype(logits.dtype).itemsize
    tile_n = _choose_row_tile(N, C, itemsize, budget)
    grid = int(pl.cdiv(N, tile_n))

    has_weight = weight is not None
    kernel = functools.partial(
        _focal_ce_rows_kernel, gamma=float(gamma), ignore_index=int(ignore_index),
        n_rows=int(N), tile_n=int(tile_n), has_weight=has_weight)

    in_specs = [
        pl.BlockSpec((tile_n, C), lambda i: (i, 0)),   # logits row tile
        pl.BlockSpec((tile_n, 1), lambda i: (i, 0)),   # targets row tile
    ]
    args = [logits, tgt]
    if has_weight:
        in_specs.append(pl.BlockSpec((1, C), lambda i: (0, 0)))
        args.append(jnp.asarray(weight, jnp.float32).reshape(1, C))

    partials = pl.pallas_call(
        kernel,
        out_shape=jax.ShapeDtypeStruct((grid, 1, 128), jnp.float32),
        grid_spec=pltpu.PrefetchScalarGridSpec(
            num_scalar_prefetch=0,
            grid=(grid,),
            in_specs=in_specs,
            out_specs=pl.BlockSpec((1, 1, 128), lambda i: (i, 0, 0)),
        ),
        compiler_params=pltpu.CompilerParams(
            dimension_semantics=("parallel",),
            vmem_limit_bytes=int(vmem_limit)),
    )(*args)

    total = jnp.sum(partials[:, 0, 0])
    count = jnp.sum(partials[:, 0, 1])
    if size_average:
        return total / count
    return total


# ----------------------------------------------------------------------------
# Public wrapper (matches FocalCELoss.forward)
# ----------------------------------------------------------------------------
def focal_ce_loss(preds, target, *, gamma=1.0, size_average=True,
                  ignore_index=-100, weight=None):
    """Pallas implementation of FocalCELoss.forward.

    preds : (B, C, H, W) float logits (NCHW, like PyTorch) or already (N, C),
            in any float dtype (bf16 fine; the kernel computes in f32).
    target: (B, H, W) (or (N,)) integer labels, may contain ignore_index.
    """
    budget, vmem_limit = _vmem_budget()
    if preds.ndim > 2:
        return _focal_ce_nchw(preds, target, gamma, size_average, ignore_index,
                              weight, budget, vmem_limit)
    return _focal_ce_rows(preds, target, gamma, size_average, ignore_index,
                          weight, budget, vmem_limit)


# ----------------------------------------------------------------------------
# Pure-JAX reference (mirrors the PyTorch module exactly)
# ----------------------------------------------------------------------------
def _reference_focal_ce(preds, target, *, gamma, ignore_index, weight, size_average):
    if preds.ndim > 2:
        B, C, H, W = preds.shape
        logits = jnp.transpose(preds, (0, 2, 3, 1)).reshape(-1, C)
    else:
        logits = preds
        C = logits.shape[1]
    logits = logits.astype(jnp.float32)
    t = target.reshape(-1)
    keep = t != ignore_index
    t_safe = jnp.where(keep, t, 0)
    logp = jax.nn.log_softmax(logits, axis=1)
    logpt = jnp.take_along_axis(logp, t_safe[:, None], axis=1)[:, 0]
    pt = jnp.exp(logpt)
    w = jnp.ones((C,), jnp.float32) if weight is None else jnp.asarray(weight, jnp.float32)
    wg = w[t_safe]
    loss = -((1.0 - pt) ** gamma) * wg * logpt
    loss = jnp.where(keep, loss, 0.0)
    if size_average:
        return jnp.sum(loss) / jnp.sum(keep.astype(jnp.float32))
    return jnp.sum(loss)


if __name__ == "__main__":
    key = jax.random.PRNGKey(0)
    kp, kt, km, k3, k4 = jax.random.split(key, 5)

    B, C, H, W = 2, 4, 16, 16
    ignore_index = -100

    preds = jax.random.normal(kp, (B, C, H, W), dtype=jnp.float32)
    target = jax.random.randint(kt, (B, H, W), 0, C, dtype=jnp.int32)
    ignore_mask = jax.random.bernoulli(km, 0.1, (B, H, W))
    target = jnp.where(ignore_mask, ignore_index, target)

    # 1) default config: gamma=1.0, unweighted, mean reduction, f32 NCHW logits
    out = focal_ce_loss(preds, target, gamma=1.0, size_average=True,
                        ignore_index=ignore_index, weight=None)
    out = jax.block_until_ready(out)
    ref = _reference_focal_ce(preds, target, gamma=1.0, ignore_index=ignore_index,
                              weight=None, size_average=True)
    assert jnp.allclose(out, ref, rtol=1e-5, atol=1e-6), (out, ref)

    # 2) class-weighted, gamma=2, sum reduction, bf16 NCHW logits
    wvec = jnp.array([0.5, 1.0, 2.0, 1.5], jnp.float32)
    preds_bf16 = preds.astype(jnp.bfloat16)
    out2 = focal_ce_loss(preds_bf16, target, gamma=2.0, size_average=False,
                         ignore_index=ignore_index, weight=wvec)
    out2 = jax.block_until_ready(out2)
    ref2 = _reference_focal_ce(preds_bf16, target, gamma=2.0, ignore_index=ignore_index,
                               weight=wvec, size_average=False)
    assert jnp.allclose(out2, ref2, rtol=1e-4, atol=1e-3), (out2, ref2)

    # 3) already-flattened (N, C) input with N not a multiple of the row tile
    #    (row-tiled path, partial last block + in-kernel row masking)
    N3, C3 = 100, 5
    k3a, k3b = jax.random.split(k3)
    logits3 = jax.random.normal(k3a, (N3, C3), dtype=jnp.float32)
    target3 = jax.random.randint(k3b, (N3,), 0, C3, dtype=jnp.int32)
    out3 = focal_ce_loss(logits3, target3, gamma=0.5, size_average=True,
                         ignore_index=ignore_index, weight=None)
    out3 = jax.block_until_ready(out3)
    ref3 = _reference_focal_ce(logits3, target3, gamma=0.5, ignore_index=ignore_index,
                               weight=None, size_average=True)
    assert jnp.allclose(out3, ref3, rtol=1e-5, atol=1e-6), (out3, ref3)

    # 4) B=1, odd spatial size, odd class count, weighted: exercises the 2-step
    #    pixel-tile split and the partial (masked) last pixel tile on the
    #    NCHW-direct path.
    B4, C4, H4, W4 = 1, 3, 10, 30
    k4a, k4b, k4c = jax.random.split(k4, 3)
    preds4 = jax.random.normal(k4a, (B4, C4, H4, W4), dtype=jnp.float32)
    target4 = jax.random.randint(k4b, (B4, H4, W4), 0, C4, dtype=jnp.int32)
    target4 = jnp.where(jax.random.bernoulli(k4c, 0.15, (B4, H4, W4)),
                        ignore_index, target4)
    wvec4 = jnp.array([1.5, 0.75, 1.0], jnp.float32)
    out4 = focal_ce_loss(preds4, target4, gamma=2.0, size_average=True,
                         ignore_index=ignore_index, weight=wvec4)
    out4 = jax.block_until_ready(out4)
    ref4 = _reference_focal_ce(preds4, target4, gamma=2.0, ignore_index=ignore_index,
                               weight=wvec4, size_average=True)
    assert jnp.allclose(out4, ref4, rtol=1e-5, atol=1e-6), (out4, ref4)

    print("KERNEL_OK")
</pallas_src>

<mosaic_0001>
module attributes {stable_mosaic.version = 11 : i64} {
  func.func @_focal_ce_nchw_kernel(%arg0: i32, %arg1: i32, %arg2: memref<1x4x256xf32, #tpu.memory_space<vmem>>, %arg3: memref<1x1x256xi32, #tpu.memory_space<vmem>>, %arg4: memref<1x1x1x128xf32, #tpu.memory_space<vmem>>) attributes {dimension_semantics = [#tpu.dimension_semantics<parallel>, #tpu.dimension_semantics<parallel>], iteration_bounds = array<i64: 2, 1>, scalar_prefetch = 0 : i64, scratch_operands = 0 : i64, tpu.core_type = #tpu.core_type<tc>, window_params = [{transform_indices = @transform_0, window_bounds = array<i64: 1, 4, 256>}, {transform_indices = @transform_1, window_bounds = array<i64: 1, 1, 256>}, {transform_indices = @transform_2, window_bounds = array<i64: 1, 1, 1, 128>}]} {
    %c0 = arith.constant 0 : index
    %c0_0 = arith.constant 0 : index
    %c0_1 = arith.constant 0 : index
    %0 = vector.load %arg2[%c0, %c0_0, %c0_1] : memref<1x4x256xf32, #tpu.memory_space<vmem>>, vector<1x4x256xf32>
    %1 = vector.shape_cast %0 : vector<1x4x256xf32> to vector<4x256xf32>
    %c0_2 = arith.constant 0 : index
    %c0_3 = arith.constant 0 : index
    %c0_4 = arith.constant 0 : index
    %2 = vector.load %arg3[%c0_2, %c0_3, %c0_4] : memref<1x1x256xi32, #tpu.memory_space<vmem>>, vector<1x1x256xi32>
    %3 = vector.shape_cast %2 : vector<1x1x256xi32> to vector<1x256xi32>
    %4 = tpu.iota {dimensions = array<i32: 1>} : vector<1x256xi32>
    %c256_i32 = arith.constant 256 : i32
    %5 = arith.muli %arg1, %c256_i32 : i32
    %6 = vector.broadcast %5 : i32 to vector<1x256xi32>
    %7 = arith.addi %6, %4 : vector<1x256xi32>
    %c256_i32_5 = arith.constant 256 : i32
    %8 = vector.broadcast %c256_i32_5 : i32 to vector<1x256xi32>
    %9 = arith.cmpi slt, %7, %8 : vector<1x256xi32>
    %10 = tpu.iota {dimensions = array<i32: 0>} : vector<4x256xi32>
    %11 = vector.broadcast %3 : vector<1x256xi32> to vector<4x256xi32>
    %12 = arith.cmpi eq, %10, %11 : vector<4x256xi32>
    %cst = arith.constant dense<0xFF800000> : vector<256xf32>
    %13 = vector.multi_reduction <maximumf>, %1, %cst [0] : vector<4x256xf32> to vector<256xf32>
    %14 = vector.shape_cast %13 : vector<256xf32> to vector<1x256xf32>
    %15 = vector.broadcast %14 : vector<1x256xf32> to vector<4x256xf32>
    %16 = arith.subf %1, %15 : vector<4x256xf32>
    %17 = math.exp %16 : vector<4x256xf32>
    %cst_6 = arith.constant dense<0.000000e+00> : vector<256xf32>
    %18 = vector.multi_reduction <add>, %17, %cst_6 [0] : vector<4x256xf32> to vector<256xf32>
    %19 = vector.shape_cast %18 : vector<256xf32> to vector<1x256xf32>
    %20 = math.log %19 : vector<1x256xf32>
    %21 = arith.addf %20, %14 : vector<1x256xf32>
    %cst_7 = arith.constant 0.000000e+00 : f32
    %22 = vector.broadcast %cst_7 : f32 to vector<4x256xf32>
    %23 = arith.select %12, %1, %22 : vector<4x256xi1>, vector<4x256xf32>
    %cst_8 = arith.constant dense<0.000000e+00> : vector<256xf32>
    %24 = vector.multi_reduction <add>, %23, %cst_8 [0] : vector<4x256xf32> to vector<256xf32>
    %25 = vector.shape_cast %24 : vector<256xf32> to vector<1x256xf32>
    %26 = arith.subf %25, %21 : vector<1x256xf32>
    %27 = math.exp %26 : vector<1x256xf32>
    %cst_9 = arith.constant 1.000000e+00 : f32
    %28 = vector.broadcast %cst_9 : f32 to vector<1x256xf32>
    %29 = arith.subf %28, %27 : vector<1x256xf32>
    %c-100_i32 = arith.constant -100 : i32
    %30 = vector.broadcast %c-100_i32 : i32 to vector<1x256xi32>
    %31 = arith.cmpi ne, %3, %30 : vector<1x256xi32>
    %32 = arith.andi %9, %31 : vector<1x256xi1>
    %cst_10 = arith.constant 0.000000e+00 : f32
    %33 = vector.broadcast %cst_10 : f32 to vector<1x256xf32>
    %34 = arith.subf %33, %29 : vector<1x256xf32>
    %35 = arith.mulf %34, %26 : vector<1x256xf32>
    %cst_11 = arith.constant 0.000000e+00 : f32
    %36 = vector.broadcast %cst_11 : f32 to vector<1x256xf32>
    %37 = arith.select %32, %35, %36 : vector<1x256xi1>, vector<1x256xf32>
    %38 = vector.shape_cast %37 : vector<1x256xf32> to vector<1x1x256xf32>
    %cst_12 = arith.constant dense<0.000000e+00> : vector<1xf32>
    %39 = vector.multi_reduction <add>, %38, %cst_12 [1, 2] : vector<1x1x256xf32> to vector<1xf32>
    %40 = vector.shape_cast %39 : vector<1xf32> to vector<1x1x1xf32>
    %41 = vector.extract %40[0, 0, 0] : f32 from vector<1x1x1xf32>
    %42 = arith.extui %32 : vector<1x256xi1> to vector<1x256xi32>
    %43 = arith.sitofp %42 : vector<1x256xi32> to vector<1x256xf32>
    %44 = vector.shape_cast %43 : vector<1x256xf32> to vector<1x1x256xf32>
    %cst_13 = arith.constant dense<0.000000e+00> : vector<1xf32>
    %45 = vector.multi_reduction <add>, %44, %cst_13 [1, 2] : vector<1x1x256xf32> to vector<1xf32>
    %46 = vector.shape_cast %45 : vector<1xf32> to vector<1x1x1xf32>
    %47 = vector.extract %46[0, 0, 0] : f32 from vector<1x1x1xf32>
    %48 = tpu.iota {dimensions = array<i32: 3>} : vector<1x1x1x128xi32>
    %c0_i32 = arith.constant 0 : i32
    %49 = vector.broadcast %c0_i32 : i32 to vector<1x1x1x128xi32>
    %50 = arith.cmpi eq, %48, %49 : vector<1x1x1x128xi32>
    %c1_i32 = arith.constant 1 : i32
    %51 = vector.broadcast %c1_i32 : i32 to vector<1x1x1x128xi32>
    %52 = arith.cmpi eq, %48, %51 : vector<1x1x1x128xi32>
    %cst_14 = arith.constant 0.000000e+00 : f32
    %53 = vector.broadcast %47 : f32 to vector<1x1x1x128xf32>
    %54 = vector.broadcast %cst_14 : f32 to vector<1x1x1x128xf32>
    %55 = arith.select %52, %53, %54 : vector<1x1x1x128xi1>, vector<1x1x1x128xf32>
    %56 = vector.broadcast %41 : f32 to vector<1x1x1x128xf32>
    %57 = arith.select %50, %56, %55 : vector<1x1x1x128xi1>, vector<1x1x1x128xf32>
    %c0_15 = arith.constant 0 : index
    %c0_16 = arith.constant 0 : index
    %c0_17 = arith.constant 0 : index
    %c0_18 = arith.constant 0 : index
    %58 = vector.load %arg4[%c0_15, %c0_16, %c0_17, %c0_18] : memref<1x1x1x128xf32, #tpu.memory_space<vmem>>, vector<1x1x1x128xf32>
    tpu.vector_store %arg4[%c0_15, %c0_16, %c0_17, %c0_18], %57 {strides = array<i32>} : memref<1x1x1x128xf32, #tpu.memory_space<vmem>>, vector<1x1x1x128xf32>,
    return
  }
  func.func @transform_0(%arg0: i32, %arg1: i32) -> (i32, i32, i32) {
    %c0_i32 = arith.constant 0 : i32
    %c0_i32_0 = arith.constant 0 : i32
    return %arg0, %c0_i32, %arg1 : i32, i32, i32
  }
  func.func @transform_1(%arg0: i32, %arg1: i32) -> (i32, i32, i32) {
    %c0_i32 = arith.constant 0 : i32
    %c0_i32_0 = arith.constant 0 : i32
    return %arg0, %c0_i32, %arg1 : i32, i32, i32
  }
  func.func @transform_2(%arg0: i32, %arg1: i32) -> (i32, i32, i32, i32) {
    %c0_i32 = arith.constant 0 : i32
    %c0_i32_0 = arith.constant 0 : i32
    %c0_i32_1 = arith.constant 0 : i32
    return %arg0, %arg1, %c0_i32, %c0_i32_0 : i32, i32, i32, i32
  }
}

</mosaic_0001>

<bundles_post_ra>
// kernel: tpu_custom_call.1
= control target key start
LH: loop header
LB: loop body
LE: loop exit
PB: predicated region body
PF: predicated region fallthrough
CT: control target
= control target key end

     0   :  { %7 = vsyncpa [#allocation3], 0  ;;  %s992_s0 = inlined_call_operand.hbm [shape: f32[2,4,256], index: 0, kind: input, shape index: {}]   ;;  %s993_s1 = inlined_call_operand.hbm [shape: s32[2,1,256], index: 1, kind: input, shape index: {}]   ;;  %s994_s2 = inlined_call_operand.hbm [shape: f32[2,1,1,128], index: 2, kind: output, shape index: {}]  }
   0x1   :  { %9 = vsyncpa [#allocation3 + $0x1], 0 }
   0x2   :  { %10 = vsyncpa [#allocation6], 0 }
   0x3   :  { %12 = vsyncpa [#allocation6 + $0x1], 0 }
   0x4   :  { %13 = vsyncpa [#allocation4], 0 }
   0x5   :  { %15 = vsyncpa [#allocation4 + $0x1], 0  ;;  %s762_s9 = smov 0   ;;  %s764_s10 = smov 0  }
   0x6   :  { %s766_s11 = smov 0   ;;  %s768_s12 = smov 0  }
   0x7   :  { %s770_s13 = smov 0   ;;  %s772_s14 = smov 0  }
   0x8 LB: > { %s490_s15 = sadd.s32 4294967295, %s740_s14   ;;  %s491_s16 = sadd.s32 4294967294, %s740_s14   ;;  %s740_s14 = sphi %s772_s14, %s21_s14   ;;  %s736_s13 = sphi %s770_s13, %s1014_s13   ;;  %s732_s12 = sphi %s768_s12, %s1013_s12   ;;  %s728_s11 = sphi %s766_s11, %s1012_s11   ;;  %s724_s10 = sphi %s764_s10, %s1011_s10   ;;  %s720_s9 = sphi %s762_s9, %s1010_s9  }
   0x9   : > { %s33_s17 = sadd.s32 1, %s736_s13  ;;  %s42_s18 = sadd.s32 1, %s728_s11 }
   0xa   : > { %p35_p0 = scmp.ge.s32.totalorder %s33_s17, 2  ;;  %p49_p1 = scmp.ne.s32.totalorder %s728_s11, %s724_s10 }
   0xb   : > { %p50_p2 = scmp.eq.s32.totalorder %s740_s14, 0  ;;  %p55_p3 = scmp.ne.s32.totalorder %s724_s10, %s720_s9 }
   0xc   : > { %s1016_s17 = smov (%p35_p0, %s33_s17), 0  ;;  %p56_p5 = scmp.eq.s32.totalorder %s490_s15, 0 }
   0xd   : > { %p803_p4 = por %p50_p2, %p49_p1  ;;  %s37_s20 = ssub.s32 %s736_s13, %s1016_s17 }
   0xe   : > { %p109_p6 = scmp.eq.s32.totalorder %s490_s15, 1  ;;  %p40_p7 = scmp.eq.s32.totalorder %s37_s20, 0 }
   0xf   : > { %p809_p8 = por %p56_p5, %p55_p3  ;;  %p115_p10 = scmp.eq.s32.totalorder %s491_s16, 1 }
  0x10   : > { %p813_p9 = por %p109_p6, %p49_p1  ;;  %p531_p13 = scmp.lt.s32.totalorder %s740_s14, 2 }
  0x11   : > { %s998_s21 = scalar_select %p809_p8, 1, 0 }
  0x12   : > { %s999_s22 = scalar_select %p813_p9, 1, 0 }
  0x13   : > { %s818_s23 = scalar_select %p40_p7, %s728_s11, %s42_s18  }
  0x14   : > { %p820_p11 = por %p115_p10, %p55_p3  ;;  %s827_s25 = sand.u32 1, %s728_s11  }
  0x15   : > { %s494_s26 = sshll.u32 %s827_s25, 3  ;;  %s508_s27 = sshll.u32 %s736_s13, 7 }
  0x16   : > { %s1000_s24 = scalar_select %p820_p11, 1, 0 }
  0x17   : > { %s834_s30 = scalar_lea.hbm %s992_s0, %s508_s27  ;;  %s139_s3 = scalar_lea.vmem [#allocation2], %s494_s26 }
  0x18   : > { %s149_s4 = sshll.u32 %s139_s3, 4  ;;  %p840_p0 = pnand %p531_p13, %p803_p4  ;;  %s836_s4 = int_to_ptr.vmem [resolvable:$true] %s149_s4 }
  0x19   : > { %s136_s6 = scalar_lea.sflag [#allocation3], %s827_s25  ;;  %s594_s7 = scalar_lea.hbm %s834_s30, 128 }
  0x1a   : > { %p595_p3 = scmp.ne.s32.totalorder %s834_s30, %s594_s7  ;;  %p596_p5 = pneg %p840_p0 }
  0x1b   : > { %s599_s16 = scalar_lea.hbm %s992_s0, 256  ;;  %p600_p4 = scmp.lt.u32.totalorder %s834_s30, %s992_s0 }
  0x1c   : > { %p597_p6 = pnand %p596_p5, %p595_p3  ;;  %p601_p10 = scmp.lt.u32.totalorder %s599_s16, %s594_s7 }
  0x1d   : > { %p603_p12 = scmp.lt.u32.totalorder %s594_s7, %s834_s30 }
  0x1e   : > { %p598_p7 = pneg %p597_p6  ;;  %p602_p13 = por %p601_p10, %p600_p4 }
  0x20   : > { %p604_p1 = por %p603_p12, %p602_p13 }
  0x22   : > { %p605_p2 = pnand %p604_p1, %p598_p7 }
  0x24   : > { %608 = shalt.err (!%p605_p2)
}
  0x25   : > { %s609_s20 = scalar_lea.vmem %s836_s4, 128  ;;  %s742_s26 = smov [#allocation2]  }
  0x26   : > { %p610_p3 = scmp.ne.s32.totalorder %s836_s4, %s609_s20  ;;  %s614_s27 = sshll.u32 %s742_s26, 4  ;;  %s615_s27 = int_to_ptr.vmem [resolvable:$false] %s614_s27 }
  0x27   : > { %s616_s28 = scalar_lea.vmem %s615_s27, 256  ;;  %p617_p9 = scmp.lt.s32.totalorder %s836_s4, %s615_s27 }
  0x28   : > { %p612_p6 = pnand %p610_p3, %p596_p5  ;;  %p618_p4 = scmp.lt.s32.totalorder %s616_s28, %s609_s20 }
  0x2a   : > { %p613_p11 = pneg %p612_p6  ;;  %p619_p10 = por %p618_p4, %p617_p9 }
  0x2c   : > { %p620_p12 = pnand %p619_p10, %p613_p11 }
  0x2e   : > { %623 = shalt.err (!%p620_p12)
}
  0x2f   : > { %523 = dma.hbm_to_vmem [thread:$0]  (!%p840_p0), %s834_s30, 128, %s836_s4, %s136_s6  }
  0x30   : > { %p1002_p1 = scmp.lt.s32.totalorder %s740_s14, 3  ;;  %p1003_p2 = scmp.ge.s32.totalorder %s740_s14, 1 }
  0x31   : > { %s497_s3 = sshll.u32 %s827_s25, 1  ;;  %s509_s7 = sshll.u32 %s736_s13, 5 }
  0x32   : > { %p876_p7 = pnand %p1003_p2, %p1002_p1  ;;  %s885_s16 = scalar_lea.hbm %s993_s1, %s509_s7 }
  0x33   : > { %s160_s18 = scalar_lea.vmem [#allocation5], %s497_s3  ;;  %s157_s30 = scalar_lea.sflag [#allocation6], %s827_s25 }
  0x34   : > { %s1004_s29 = scalar_select %p876_p7, 1, 0 }
  0x35   : > { %s170_s19 = sshll.u32 %s160_s18, 4  ;;  %s624_s4 = scalar_lea.hbm %s885_s16, 32  ;;  %s171_s19 = int_to_ptr.vmem [resolvable:$true] %s170_s19 }
  0x36   : > { %p625_p9 = scmp.ne.s32.totalorder %s885_s16, %s624_s4  ;;  %s629_s26 = scalar_lea.hbm %s993_s1, 64 }
  0x37   : > { %p630_p3 = scmp.lt.u32.totalorder %s885_s16, %s993_s1  ;;  %p631_p6 = scmp.lt.u32.totalorder %s629_s26, %s624_s4 }
  0x38   : > { %p627_p11 = pnand %p625_p9, %p596_p5  ;;  %p633_p10 = scmp.lt.u32.totalorder %s624_s4, %s885_s16 }
  0x39   : > { %p632_p4 = por %p631_p6, %p630_p3 }
  0x3a   : > { %p628_p13 = pneg %p627_p11 }
  0x3b   : > { %p634_p12 = por %p633_p10, %p632_p4 }
  0x3d   : > { %p635_p1 = pnand %p634_p12, %p628_p13 }
  0x3f   : > { %638 = shalt.err (!%p635_p1)
}
  0x40   : > { %s639_s25 = scalar_lea.vmem %s171_s19, 32  ;;  %s743_s3 = smov [#allocation5]  }
  0x41   : > { %p640_p2 = scmp.ne.s32.totalorder %s171_s19, %s639_s25  ;;  %s644_s7 = sshll.u32 %s743_s3, 4  ;;  %s645_s7 = int_to_ptr.vmem [resolvable:$false] %s644_s7 }
  0x42   : > { %s646_s8 = scalar_lea.vmem %s645_s7, 64  ;;  %p647_p8 = scmp.lt.s32.totalorder %s171_s19, %s645_s7 }
  0x43   : > { %p642_p9 = pnand %p640_p2, %p596_p5  ;;  %p648_p7 = scmp.lt.s32.totalorder %s646_s8, %s639_s25 }
  0x45   : > { %p643_p11 = pneg %p642_p9  ;;  %p649_p3 = por %p648_p7, %p647_p8 }
  0x47   : > { %p650_p6 = pnand %p649_p3, %p643_p11 }
  0x49   : > { %653 = shalt.err (!%p650_p6)
}
  0x4a   : > { %526 = dma.hbm_to_vmem [thread:$0]  (!%p840_p0), %s885_s16, 32, %s171_s19, %s157_s30  }
  0x4b   : > { %p1005_p13 = scmp.ne.s32.totalorder %s1004_s29, 0 }
  0x4c   : > { %s910_s15 = sand.u32 (!%p1005_p13), 1, %s724_s10   ;;  %p1006_p5 = scmp.ne.s32.totalorder (!%p1005_p13), %s998_s21, 0 }
  0x4d   : > { %179 = sbr.rel (%p1005_p13) target bundleno = 401 (0x191), region = 28  ;;  %s501_s18 = sshll.u32 (!%p1005_p13), %s910_s15, 3 }
  0x4e   : > { %s182_s4 = scalar_lea.sflag (!%p1005_p13), [#allocation3], %s910_s15  ;;  %s185_s6 = scalar_lea.vmem (!%p1005_p13), [#allocation2], %s501_s18 }
  0x54   : > { %707 = dma.done.wait (%p1006_p5), %s182_s4, 128  }
  0x55   : > { %709 = vsyncadd (%p1006_p5), %s182_s4, 4294967168  ;;  %s502_s5 = sshll.u32 %s910_s15, 1  ;;  %s191_s29 = scalar_lea.sflag [#allocation6], %s910_s15 }
  0x56   : > { %s194_s16 = scalar_lea.vmem [#allocation5], %s502_s5 }
  0x57   : > { %711 = dma.done.wait (%p1006_p5), %s191_s29, 32  }
  0x58   : > { %713 = vsyncadd (%p1006_p5), %s191_s29, 4294967264  ;;  %vm247_vm0 = vcmask 1043456   ;;  %v221_v0 = vld [vmem:[%s185_s6] sm:$0xff]  ;;  %v223_v13 = vlaneseq  ;;  %v222_v22 = vld [vmem:[%s194_s16] sm:$0x3]  ;;  %vm336_vm5 = vcmask 1040384  }
  0x59   : > { %v245_v1 = vcombine.high %v221_v0, %v221_v0  ;;  %v248_v2 = vsel %vm247_vm0, %v221_v0, -inf  ;;  %vm316_vm3 = vcmp.ne.s32.totalorder %v222_v22, 4294967196  ;;  %s505_s21 = sshll.u32 %s732_s12, 4  ;;  %s218_s30 = scalar_lea.vmem [#allocation7], %s910_s15 }
  0x5a   : > { %v249_v3 = vrot.slane %v248_v2, 4  ;;  %v927_v17 = vshrl.u32 %v223_v13, 7  ;;  %s386_s20 = sshll.u32 %s218_s30, 4  ;;  %s943_s25 = scalar_lea.hbm %s994_s2, %s505_s21  ;;  %s945_s20 = int_to_ptr.vmem [resolvable:$true] %s386_s20 }
  0x5b   : > { %v255_v4 = vsel %vm247_vm0, %v245_v1, -inf  ;;  %s373_s12 = scalar_lea.sflag [#allocation4], %s910_s15  ;;  %s654_s3 = scalar_lea.vmem %s945_s20, 16 }
  0x5c   : > { %v250_v5 = vmax.f32 %v248_v2, %v249_v3  ;;  %v256_v6 = vrot.slane %v255_v4, 4  ;;  %v236_v20 = vsub.s32 0, %v927_v17  ;;  %v240_v23 = vsub.s32 1, %v927_v17  ;;  %p655_p8 = scmp.ne.s32.totalorder %s945_s20, %s654_s3  ;;  %p1007_p0 = scmp.ne.s32.totalorder %s999_s22, 0 }
  0x5d   : > { %s746_s7 = smov [#allocation7]  }
  0x5e   : > { %v251_v7 = vrot.slane %v250_v5, 2  ;;  %v257_v8 = vmax.f32 %v255_v4, %v256_v6  ;;  %v237_v24 = vrot.slane %v222_v22, %v236_v20  ;;  %v241_v25 = vrot.slane %v222_v22, %v240_v23  ;;  %p656_p7 = pnand %p655_p8, %p1007_p0  ;;  %s658_s8 = sshll.u32 %s746_s7, 4  ;;  %s659_s8 = int_to_ptr.vmem [resolvable:$false] %s658_s8 }
  0x5f   : > { %v744_v4 = vmov 0   ;;  %s660_s18 = scalar_lea.vmem %s659_s8, 32  ;;  %p661_p10 = scmp.lt.s32.totalorder %s945_s20, %s659_s8 }
  0x60   : > { %v252_v9 = vmax.f32 %v250_v5, %v251_v7  ;;  %v258_v10 = vrot.slane %v257_v8, 2  ;;  %vm242_vm1 = vcmp.eq.s32.totalorder %v927_v17, %v237_v24  ;;  %vm243_vm2 = vcmp.eq.s32.totalorder %v927_v17, %v241_v25  ;;  %p657_p4 = pneg %p656_p7  ;;  %p662_p12 = scmp.lt.s32.totalorder %s660_s18, %s654_s3 }
  0x61   : > { %v292_v26 = vsel %vm242_vm1, %v221_v0, 0.0  ;;  %v293_v30 = vsel %vm243_vm2, %v245_v1, 0.0  ;;  %v317_v5 = vsel %vm316_vm3, 1, %v744_v4 }
  0x62   : > { %v253_v11 = vrot.slane %v252_v9, 1  ;;  %v259_v12 = vmax.f32 %v257_v8, %v258_v10  ;;  %v294_v32 = vsel %vm247_vm0, %v292_v26, 0.0  ;;  %v301_v36 = vsel %vm247_vm0, %v293_v30, 0.0  ;;  %p663_p1 = por %p662_p12, %p661_p10 }
  0x63   : > { %v295_v37 = vrot.slane %v294_v32, 4  ;;  %v302_v40 = vrot.slane %v301_v36, 4  ;;  %v321_v7 = vrot.slane %v317_v5, %v236_v20  ;;  %v325_v10 = vrot.slane %v317_v5, %v240_v23 }
  0x64   : > { %v254_v14 = vmax.f32 %v252_v9, %v253_v11  ;;  %v260_v15 = vrot.slane %v259_v12, 1  ;;  %p664_p2 = pnand %p663_p1, %p657_p4 }
  0x65   : > { %v296_v43 = vadd.f32 %v295_v37, %v294_v32  ;;  %v303_v46 = vadd.f32 %v302_v40, %v301_v36  ;;  %vm326_vm4 = vcmp.ne.s32.totalorder %v321_v7, 0  ;;  %vm327_vm6 = vcmp.ne.s32.totalorder %v325_v10, 0 }
  0x66   : > { %v261_v16 = vmax.f32 %v259_v12, %v260_v15 }
  0x67   : > { %v297_v49 = vrot.slane %v296_v43, 2  ;;  %v304_v51 = vrot.slane %v303_v46, 2 }
  0x68   : > { %v264_v18 = vcombine.low %v254_v14, %v261_v16 }
  0x69   : > { %v298_v52 = vadd.f32 %v297_v49, %v296_v43  ;;  %v305_v53 = vadd.f32 %v304_v51, %v303_v46 }
  0x6a   : > { %v266_v19 = vsub.f32 %v221_v0, %v264_v18  ;;  %v745_v18 = vmov 0.0  }
  0x6b   : > { %v299_v54 = vrot.slane %v298_v52, 1  ;;  %v306_v55 = vrot.slane %v305_v53, 1 }
  0x6c   : > { %v267_v21 = vmul.f32 1.442695, %v266_v19  ;;  %v503_v19 = vsel %vm326_vm4, 1.0, %v745_v18 }
  0x6d   : > { %v300_v58 = vadd.f32 %v299_v54, %v298_v52  ;;  %v307_v62 = vadd.f32 %v306_v55, %v305_v53  ;;  %v353_v26 = vsel %vm336_vm5, %v503_v19, 0.0 }
  0x6e   : > { %584 = vpow2.f32 %v267_v21  ;;  %v504_v21 = vsel %vm327_vm6, 1.0, %v745_v18 }
  0x6f   : > { %v354_v20 = vsel %vm336_vm5, %v504_v21, 0.0 }
  0x70   : > { %v355_v23 = vadd.f32 %v354_v20, %v353_v26 }
  0x78   : > { %v585_v27 = vpop.eup %584 }
  0x79   : > { %v270_v28 = vcombine.high %v585_v27, %v585_v27  ;;  %v272_v29 = vsel %vm247_vm0, %v585_v27, 0.0 }
  0x7a   : > { %v273_v31 = vrot.slane %v272_v29, 4 }
  0x7b   : > { %v279_v33 = vsel %vm247_vm0, %v270_v28, 0.0 }
  0x7c   : > { %v274_v34 = vadd.f32 %v273_v31, %v272_v29  ;;  %v280_v35 = vrot.slane %v279_v33, 4 }
  0x7e   : > { %v275_v38 = vrot.slane %v274_v34, 2  ;;  %v281_v39 = vadd.f32 %v280_v35, %v279_v33 }
  0x80   : > { %v276_v41 = vadd.f32 %v275_v38, %v274_v34  ;;  %v282_v42 = vrot.slane %v281_v39, 2 }
  0x82   : > { %v277_v44 = vrot.slane %v276_v41, 1  ;;  %v283_v45 = vadd.f32 %v282_v42, %v281_v39  ;;  %v224_v42 = vand.u32 127, %v223_v13 }
  0x84   : > { %v278_v47 = vadd.f32 %v277_v44, %v276_v41  ;;  %v284_v48 = vrot.slane %v283_v45, 1  ;;  %vm366_vm7 = vcmp.eq.s32.totalorder %v224_v42, 1  ;;  %vm365_vm8 = vcmp.eq.s32.totalorder %v224_v42, 0 }
  0x86   : > { %v285_v50 = vadd.f32 %v284_v48, %v283_v45  ;;  %586 = vlog2.f32 %v278_v47 }
  0x88   : > { %588 = vlog2.f32 %v285_v50 }
  0x90   : > { %v587_v56 = vpop.eup %586 }
  0x91   : > { %v287_v57 = vmul.f32 0.6931472, %v587_v56 }
  0x92   : > { %v589_v59 = vpop.eup %588 }
  0x93   : > { %v289_v60 = vmul.f32 0.6931472, %v589_v59  ;;  %v290_v61 = vadd.f32 %v287_v57, %v254_v14 }
  0x95   : > { %v291_v63 = vadd.f32 %v289_v60, %v261_v16  ;;  %v308_v0 = vsub.f32 %v300_v58, %v290_v61 }
  0x97   : > { %v309_v1 = vsub.f32 %v307_v62, %v291_v63  ;;  %v310_v2 = vmul.f32 1.442695, %v308_v0 }
  0x99   : > { %590 = vpow2.f32 %v310_v2  ;;  %v312_v3 = vmul.f32 1.442695, %v309_v1 }
  0x9b   : > { %592 = vpow2.f32 %v312_v3 }
  0xa3   : > { %v591_v6 = vpop.eup %590 }
  0xa4   : > { %v314_v8 = vsub.f32 1.0, %v591_v6 }
  0xa5   : > { %v593_v9 = vpop.eup %592 }
  0xa6   : > { %v315_v11 = vsub.f32 1.0, %v593_v9  ;;  %v330_v12 = vsub.f32 0.0, %v314_v8 }
  0xa8   : > { %v331_v14 = vsub.f32 0.0, %v315_v11  ;;  %v332_v15 = vmul.f32 %v330_v12, %v308_v0 }
  0xaa   : > { %v333_v16 = vmul.f32 %v331_v14, %v309_v1  ;;  %v334_v17 = vsel %vm326_vm4, %v332_v15, 0.0 }
  0xab   : > { %v337_v22 = vsel %vm336_vm5, %v334_v17, 0.0 }
  0xac   : > { %v335_v24 = vsel %vm327_vm6, %v333_v16, 0.0 }
  0xad   : > { %v338_v25 = vsel %vm336_vm5, %v335_v24, 0.0 }
  0xae   : > { %v339_v27 = vadd.f32 %v338_v25, %v337_v22 }
  0xb0   : > { %340 = vadd.xlane.f32.xlu0 %v339_v27 }
  0xb4   : > { %356 = vadd.xlane.f32.xlu0 %v355_v23 }
 0x13d   : > { %v341_v28 = vpop.xlane.xlu0 %340 }
 0x13e   : > { %v342_v29 = vrot.slane %v341_v28, 4 }
 0x140   : > { %v343_v30 = vadd.f32 %v342_v29, %v341_v28 }
 0x141   : > { %v357_v31 = vpop.xlane.xlu0 %356 }
 0x142   : > { %v344_v32 = vrot.slane %v343_v30, 2  ;;  %v358_v33 = vrot.slane %v357_v31, 4 }
 0x144   : > { %v359_v34 = vadd.f32 %v358_v33, %v357_v31  ;;  %v345_v35 = vadd.f32 %v344_v32, %v343_v30 }
 0x146   : > { %v360_v36 = vrot.slane %v359_v34, 2  ;;  %v346_v37 = vrot.slane %v345_v35, 1 }
 0x148   : > { %v361_v38 = vadd.f32 %v360_v36, %v359_v34  ;;  %v347_v39 = vadd.f32 %v346_v37, %v345_v35 }
 0x14a   : > { %510 = vpush %v347_v39  ;;  %v362_v40 = vrot.slane %v361_v38, 1 }
 0x14c   : > { %v363_v41 = vadd.f32 %v362_v40, %v361_v38 }
 0x14e   : > { %512 = vpush %v363_v41 }
 0x17b   : > { %s511_s19 = spop %510 }
 0x17c   : > { %v369_v44 = vstv %s511_s19 }
 0x17f   : > { %s513_s26 = spop %512 }
 0x180   : > { %v367_v43 = vstv %s513_s26 }
 0x181   : > { %v368_v45 = vsel %vm366_vm7, %v367_v43, 0.0 }
 0x182   : > { %v370_v13 = vsel %vm365_vm8, %v369_v44, %v368_v45 }
 0x183   : > { %371 = vst [vmem:[%s218_s30] sm:$0x1] %v370_v13 }
 0x184   : > { %667 = shalt.err (!%p664_p2)
}
 0x185   : > { %s668_s15 = scalar_lea.hbm %s943_s25, 16  ;;  %s672_s5 = scalar_lea.hbm %s994_s2, 32 }
 0x186   : > { %p669_p9 = scmp.ne.s32.totalorder %s943_s25, %s668_s15  ;;  %p673_p6 = scmp.lt.u32.totalorder %s943_s25, %s994_s2 }
 0x187   : > { %p674_p13 = scmp.lt.u32.totalorder %s672_s5, %s668_s15  ;;  %p676_p8 = scmp.lt.u32.totalorder %s668_s15, %s943_s25 }
 0x188   : > { %p670_p11 = pnand %p669_p9, %p1007_p0 }
 0x189   : > { %p675_p5 = por %p674_p13, %p673_p6 }
 0x18a   : > { %p671_p3 = pneg %p670_p11 }
 0x18b   : > { %p677_p7 = por %p676_p8, %p675_p5 }
 0x18d   : > { %p678_p4 = pnand %p677_p7, %p671_p3 }
 0x18f   : > { %681 = shalt.err (!%p678_p4)
}
 0x190   : > { %518 = dma.vmem_to_hbm [thread:$0]  (%p1007_p0), %s945_s20, 16, %s943_s25, %s373_s12  }
 0x191 PF: > { %s398_s21 = sand.u32 1, %s720_s9   ;;  %p1008_p10 = scmp.ne.s32.totalorder %s1000_s24, 0 }
 0x192   : > { %p1009_p12 = scmp.ge.s32.totalorder %s740_s14, 2  ;;  %s399_s19 = scalar_lea.sflag [#allocation4], %s398_s21 }
 0x194   : > { %p528_p1 = pnand %p1009_p12, %p1008_p10 }
 0x196   : > { %715 = dma.done.wait (!%p528_p1), %s399_s19, 16  }
 0x197   : > { %717 = vsyncadd (!%p528_p1), %s399_s19, 4294967280  ;;  %s21_s14 = sadd.s32 1, %s740_s14   ;;  %s1010_s9 = smov %s724_s10 }
 0x198   : > { %p18_p2 = scmp.ge.s32.totalorder %s21_s14, 4   ;;  %s1011_s10 = smov %s728_s11 }
 0x199   : > { %s1012_s11 = smov %s818_s23  ;;  %s1013_s12 = smov %s736_s13 }
 0x19a   : > { %s1014_s13 = smov %s1016_s17  ;;  %20 = sbr.rel (!%p18_p2) target bundleno = 8 (0x8), region = 86 }
 0x1a1   :  { %403 = vsyncpa [#allocation3], 1 }
 0x1a2   :  { %405 = vsyncpa [#allocation3 + $0x1], 1 }
 0x1a3   :  { %406 = vsyncpa [#allocation6], 1 }
 0x1a4   :  { %408 = vsyncpa [#allocation6 + $0x1], 1 }
 0x1a5   :  { %409 = vsyncpa [#allocation4], 1 }
 0x1a6   :  { %411 = vsyncpa [#allocation4 + $0x1], 1 }

</bundles_post_ra>
